<compile_context>
chip_gen: v6e
topology: v6e:2x2x1
jax: 0.10.0
libtpu: 0.0.40
codegen_flags: <defaults>
</compile_context>

<pallas_src>
import jax
import jax.numpy as jnp
from jax.experimental import pallas as pl
from jax.experimental.pallas import tpu as pltpu

BETA = 0.9        # membrane decay
THRESHOLD = 1.0   # spiking threshold


def _snn_kernel(x_ref, w_in_ref, b_in_ref, w_out_ref, b_out_ref,
                out_ref, spk_ref, mem_ref,
                v_scratch, z_scratch):
    # grid = (batch_blocks, time_blocks); time is innermost ("arbitrary")
    t_blk = pl.program_id(1)

    # reset the carried membrane potential at the first time block (s = None)
    @pl.when(t_blk == 0)
    def _():
        v_scratch[...] = jnp.zeros_like(v_scratch)

    t_block, b_tile, fi_p = x_ref.shape
    hi_p = w_in_ref.shape[1]
    fo_p = w_out_ref.shape[1]

    # ---- fc_in for the whole time block: ONE big MXU matmul ----------------
    # (t_block*b_tile, F_in) @ (F_in, H) in bf16 with f32 accumulation.
    x_all = x_ref[...].reshape(t_block * b_tile, fi_p)
    z_all = jnp.dot(x_all, w_in_ref[...],
                    preferred_element_type=jnp.float32) + b_in_ref[...]
    z_scratch[...] = z_all.reshape(t_block, b_tile, hi_p)

    # ---- sequential LIF recurrence: elementwise only (VPU) ------------------
    def step(i, carry):
        z = z_scratch[i]                                   # (b_tile, hi_p) f32
        v = BETA * v_scratch[...] + z
        spk = (v > THRESHOLD).astype(jnp.bfloat16)         # exactly 0/1
        mem_ref[i] = v                                     # membrane BEFORE reset
        spk_ref[i] = spk                                   # staged for fc_out
        v_scratch[...] = jnp.where(v > THRESHOLD, v - THRESHOLD, v)  # subtract reset
        return carry

    jax.lax.fori_loop(0, t_block, step, 0, unroll=min(t_block, 8))

    # ---- fc_out for the whole time block: ONE big MXU matmul ---------------
    # spikes are exactly 0/1 -> bf16 staging is lossless.
    spk_all = spk_ref[...].reshape(t_block * b_tile, hi_p)
    out_all = jnp.dot(spk_all, w_out_ref[...],
                      preferred_element_type=jnp.float32) + b_out_ref[...]
    out_ref[...] = out_all.reshape(t_block, b_tile, fo_p)  # single lane-dense slab


def _round_up(n, m):
    return ((n + m - 1) // m) * m


def _num_tensorcores():
    """Best-effort TensorCore count (2 on v7x, 1 on v5e/v6e)."""
    try:
        d = jax.devices()[0]
        nc = getattr(d, "num_cores", None)
        if nc is not None:
            return max(1, int(nc))
        kind = str(getattr(d, "device_kind", "")).lower()
        if "v7" in kind:
            return 2
    except Exception:
        pass
    return 1


def _vmem_capacity_bytes():
    try:
        return int(pltpu.get_tpu_info().vmem_capacity_bytes)
    except Exception:
        return 64 * 1024 * 1024   # conservative (v7x per-TC capacity)


def _vmem_estimate(t_block, b_tile, fi_p, hi_p, fo_p):
    """Rough per-grid-step VMEM footprint (double-buffered blocks + scratch)."""
    x_blk = t_block * b_tile * fi_p * 2           # bf16 input block
    out_blk = t_block * b_tile * fo_p * 4         # f32 output block
    spk_blk = t_block * b_tile * hi_p * 2         # bf16 spike block
    mem_blk = t_block * b_tile * hi_p * 4         # f32 membrane block
    wts = (fi_p * hi_p + hi_p * fo_p) * 2 + (hi_p + fo_p) * 4
    scratch = b_tile * hi_p * 4 + t_block * b_tile * hi_p * 4
    return 2 * (x_blk + out_blk + spk_blk + mem_blk + wts) + scratch


def snn_forward(x, w_in, b_in, w_out, b_out):
    """
    x:      (seq, batch, input_features)
    w_in:   (hidden, input)               b_in:  (hidden,)
    w_out:  (output, hidden)              b_out: (output,)
    returns (outputs, spikes_record, membrane_record)
      outputs:          (seq, batch, output)   f32
      spikes_record:    (seq, batch, hidden)   bf16 (exact 0/1)
      membrane_record:  (seq, batch, hidden)   f32
    """
    seq, batch, f_in = x.shape
    hidden = w_in.shape[0]
    f_out = w_out.shape[0]

    # Padded hidden lanes (zero input, zero bias) must never spike.
    assert THRESHOLD > 0.0, "zero-padded lanes would spike with THRESHOLD <= 0"

    # --- lane/sublane padding: features -> x128 (lane axis), batch -> x8 ----
    # (For real models with dims >= 256 padding to 256 aligns with the v6e/v7x
    #  native MXU tile; 128 is kept here since demo dims are small.)
    b_p = _round_up(batch, 8)
    fi_p = _round_up(f_in, 128)
    hi_p = _round_up(hidden, 128)
    fo_p = _round_up(f_out, 128)

    # --- batch tiling: split across TensorCores only when there are >1 (v7x) -
    cores = _num_tensorcores()
    if cores >= 2 and b_p % (8 * cores) == 0 and b_p // cores >= 8:
        b_tile = b_p // cores
    else:
        b_tile = b_p

    # --- time blocking: pad seq up to a VMEM-budgeted block size -------------
    vmem_cap = _vmem_capacity_bytes()
    vmem_limit = min(max(vmem_cap * 3 // 4, 32 * 1024 * 1024), 100 * 1024 * 1024)
    t_block = min(64, _round_up(seq, 8))
    while t_block > 8 and _vmem_estimate(t_block, b_tile, fi_p, hi_p, fo_p) > vmem_limit:
        t_block //= 2
    seq_p = _round_up(seq, t_block)

    # --- padded / pre-transposed operands ------------------------------------
    x_p = jnp.zeros((seq_p, b_p, fi_p), jnp.bfloat16)
    x_p = x_p.at[:seq, :batch, :f_in].set(x.astype(jnp.bfloat16))

    w_in_t = jnp.zeros((fi_p, hi_p), jnp.bfloat16)
    w_in_t = w_in_t.at[:f_in, :hidden].set(w_in.T.astype(jnp.bfloat16))
    w_out_t = jnp.zeros((hi_p, fo_p), jnp.bfloat16)
    w_out_t = w_out_t.at[:hidden, :f_out].set(w_out.T.astype(jnp.bfloat16))

    b_in_p = jnp.zeros((1, hi_p), jnp.float32)
    b_in_p = b_in_p.at[0, :hidden].set(b_in.astype(jnp.float32))
    b_out_p = jnp.zeros((1, fo_p), jnp.float32)
    b_out_p = b_out_p.at[0, :f_out].set(b_out.astype(jnp.float32))

    out_shapes = (
        jax.ShapeDtypeStruct((seq_p, b_p, fo_p), jnp.float32),    # outputs
        jax.ShapeDtypeStruct((seq_p, b_p, hi_p), jnp.bfloat16),   # spikes (0/1)
        jax.ShapeDtypeStruct((seq_p, b_p, hi_p), jnp.float32),    # membrane
    )

    grid_spec = pltpu.PrefetchScalarGridSpec(
        num_scalar_prefetch=0,
        grid=(b_p // b_tile, seq_p // t_block),                   # (batch, time)
        in_specs=[
            pl.BlockSpec((t_block, b_tile, fi_p), lambda b, t: (t, b, 0)),  # x
            pl.BlockSpec((fi_p, hi_p), lambda b, t: (0, 0)),                # W_in^T
            pl.BlockSpec((1, hi_p), lambda b, t: (0, 0)),                   # b_in
            pl.BlockSpec((hi_p, fo_p), lambda b, t: (0, 0)),                # W_out^T
            pl.BlockSpec((1, fo_p), lambda b, t: (0, 0)),                   # b_out
        ],
        out_specs=[
            pl.BlockSpec((t_block, b_tile, fo_p), lambda b, t: (t, b, 0)),
            pl.BlockSpec((t_block, b_tile, hi_p), lambda b, t: (t, b, 0)),
            pl.BlockSpec((t_block, b_tile, hi_p), lambda b, t: (t, b, 0)),
        ],
        scratch_shapes=[
            pltpu.VMEM((b_tile, hi_p), jnp.float32),              # membrane carry
            pltpu.VMEM((t_block, b_tile, hi_p), jnp.float32),     # z_in for block
        ],
    )

    out_p, spk_p, mem_p = pl.pallas_call(
        _snn_kernel,
        out_shape=out_shapes,
        grid_spec=grid_spec,
        compiler_params=pltpu.CompilerParams(
            # batch tiles are independent (sharded across TCs on v7x);
            # time recurrence => sequential innermost axis.
            dimension_semantics=("parallel", "arbitrary"),
            vmem_limit_bytes=vmem_limit),
    )(x_p, w_in_t, b_in_p, w_out_t, b_out_p)

    # strip padding (time, batch, features)
    return (out_p[:seq, :batch, :f_out],
            spk_p[:seq, :batch, :hidden],
            mem_p[:seq, :batch, :hidden])


def _snn_reference(x, w_in, b_in, w_out, b_out):
    """Pure-JAX reference with identical bf16-matmul / f32-LIF semantics."""
    xb = x.astype(jnp.bfloat16)
    wi = w_in.T.astype(jnp.bfloat16)
    wo = w_out.T.astype(jnp.bfloat16)
    b_in = b_in.astype(jnp.float32)
    b_out = b_out.astype(jnp.float32)

    def step(v, x_t):
        z = jnp.dot(x_t, wi, preferred_element_type=jnp.float32) + b_in
        v = BETA * v + z
        spk = (v > THRESHOLD).astype(jnp.float32)
        out = jnp.dot(spk.astype(jnp.bfloat16), wo,
                      preferred_element_type=jnp.float32) + b_out
        return v - spk * THRESHOLD, (out, spk, v)

    v0 = jnp.zeros((x.shape[1], w_in.shape[0]), jnp.float32)
    _, (outs, spks, mems) = jax.lax.scan(step, v0, xb)
    return outs, spks, mems


def _init_linear(key, out_f, in_f):
    """PyTorch nn.Linear default init: U(-1/sqrt(in_f), 1/sqrt(in_f))."""
    kw, kb = jax.random.split(key)
    bound = 1.0 / jnp.sqrt(jnp.float32(in_f))
    w = jax.random.uniform(kw, (out_f, in_f), jnp.float32, -bound, bound)
    b = jax.random.uniform(kb, (out_f,), jnp.float32, -bound, bound)
    return w, b


if __name__ == "__main__":
    seq, batch = 8, 8
    input_features, hidden_features, output_features = 32, 32, 16

    key = jax.random.PRNGKey(0)
    kx, k1, k2 = jax.random.split(key, 3)

    x = jax.random.normal(kx, (seq, batch, input_features), jnp.float32)
    w_in, b_in = _init_linear(k1, hidden_features, input_features)
    w_out, b_out = _init_linear(k2, output_features, hidden_features)

    outputs, spikes_rec, mem_rec = snn_forward(x, w_in, b_in, w_out, b_out)
    jax.block_until_ready((outputs, spikes_rec, mem_rec))

    assert outputs.shape == (seq, batch, output_features)
    assert spikes_rec.shape == (seq, batch, hidden_features)
    assert mem_rec.shape == (seq, batch, hidden_features)
    assert bool(jnp.all(jnp.isfinite(outputs)))
    # spikes must be exactly 0/1
    assert bool(jnp.all((spikes_rec == 0) | (spikes_rec == 1)))

    # correctness vs. pure-JAX reference (same bf16 matmul semantics).
    # mismatch-fraction check tolerates a rare borderline spike flip from
    # accumulation-order differences near the threshold.
    ref_out, ref_spk, ref_mem = _snn_reference(x, w_in, b_in, w_out, b_out)
    mem_bad = jnp.mean((jnp.abs(mem_rec - ref_mem) > 1e-2).astype(jnp.float32))
    out_bad = jnp.mean((jnp.abs(outputs - ref_out) > 1e-2).astype(jnp.float32))
    assert float(mem_bad) < 0.02, f"membrane mismatch fraction {float(mem_bad)}"
    assert float(out_bad) < 0.02, f"output mismatch fraction {float(out_bad)}"

    print("KERNEL_OK")
</pallas_src>

<mosaic_0001>
module attributes {stable_mosaic.version = 11 : i64} {
  func.func @_snn_kernel(%arg0: i32, %arg1: i32, %arg2: memref<8x8x128xbf16, #tpu.memory_space<vmem>>, %arg3: memref<128x128xbf16, #tpu.memory_space<vmem>>, %arg4: memref<1x128xf32, #tpu.memory_space<vmem>>, %arg5: memref<128x128xbf16, #tpu.memory_space<vmem>>, %arg6: memref<1x128xf32, #tpu.memory_space<vmem>>, %arg7: memref<8x8x128xf32, #tpu.memory_space<vmem>>, %arg8: memref<8x8x128xbf16, #tpu.memory_space<vmem>>, %arg9: memref<8x8x128xf32, #tpu.memory_space<vmem>>, %arg10: memref<8x128xf32, #tpu.memory_space<vmem>>, %arg11: memref<8x8x128xf32, #tpu.memory_space<vmem>>) attributes {dimension_semantics = [#tpu.dimension_semantics<parallel>, #tpu.dimension_semantics<arbitrary>], iteration_bounds = array<i64: 1, 1>, scalar_prefetch = 0 : i64, scratch_operands = 2 : i64, tpu.core_type = #tpu.core_type<tc>, window_params = [{transform_indices = @transform_0, window_bounds = array<i64: 8, 8, 128>}, {pipeline_mode = #tpu.pipeline_mode<synchronous>, transform_indices = @transform_1, window_bounds = array<i64: 128, 128>}, {pipeline_mode = #tpu.pipeline_mode<synchronous>, transform_indices = @transform_2, window_bounds = array<i64: 1, 128>}, {pipeline_mode = #tpu.pipeline_mode<synchronous>, transform_indices = @transform_3, window_bounds = array<i64: 128, 128>}, {pipeline_mode = #tpu.pipeline_mode<synchronous>, transform_indices = @transform_4, window_bounds = array<i64: 1, 128>}, {transform_indices = @transform_5, window_bounds = array<i64: 8, 8, 128>}, {transform_indices = @transform_6, window_bounds = array<i64: 8, 8, 128>}, {transform_indices = @transform_7, window_bounds = array<i64: 8, 8, 128>}]} {
    %c0_i32 = arith.constant 0 : i32
    %0 = arith.cmpi eq, %arg1, %c0_i32 : i32
    %1 = arith.extui %0 : i1 to i32
    %c0_i32_0 = arith.constant 0 : i32
    %2 = arith.cmpi ne, %1, %c0_i32_0 : i32
    scf.if %2 {
      %cst_134 = arith.constant 0.000000e+00 : f32
      %229 = vector.broadcast %cst_134 : f32 to vector<8x128xf32>
      %c0_135 = arith.constant 0 : index
      %c0_136 = arith.constant 0 : index
      %230 = vector.load %arg10[%c0_135, %c0_136] : memref<8x128xf32, #tpu.memory_space<vmem>>, vector<8x128xf32>
      tpu.vector_store %arg10[%c0_135, %c0_136], %229 {strides = array<i32>} : memref<8x128xf32, #tpu.memory_space<vmem>>, vector<8x128xf32>,
    } else {
    }
    %c0 = arith.constant 0 : index
    %c0_1 = arith.constant 0 : index
    %c0_2 = arith.constant 0 : index
    %3 = vector.load %arg2[%c0, %c0_1, %c0_2] : memref<8x8x128xbf16, #tpu.memory_space<vmem>>, vector<8x8x128xbf16>
    %4 = vector.shape_cast %3 : vector<8x8x128xbf16> to vector<64x128xbf16>
    %c0_3 = arith.constant 0 : index
    %c0_4 = arith.constant 0 : index
    %5 = vector.load %arg3[%c0_3, %c0_4] : memref<128x128xbf16, #tpu.memory_space<vmem>>, vector<128x128xbf16>
    %cst = arith.constant dense<0.000000e+00> : vector<64x128xf32>
    %6 = tpu.matmul %4, %5, %cst {dimension_numbers = #tpu.dot_dimension_numbers<[1], [0], [0], [1], [0, 0, 1, 1], [], []>} : vector<64x128xbf16>, vector<128x128xbf16>, vector<64x128xf32> -> vector<64x128xf32>
    %c0_5 = arith.constant 0 : index
    %c0_6 = arith.constant 0 : index
    %7 = vector.load %arg4[%c0_5, %c0_6] : memref<1x128xf32, #tpu.memory_space<vmem>>, vector<1x128xf32>
    %8 = vector.broadcast %7 : vector<1x128xf32> to vector<64x128xf32>
    %9 = arith.addf %6, %8 : vector<64x128xf32>
    %10 = vector.shape_cast %9 : vector<64x128xf32> to vector<8x8x128xf32>
    %c0_7 = arith.constant 0 : index
    %c0_8 = arith.constant 0 : index
    %c0_9 = arith.constant 0 : index
    %11 = vector.load %arg11[%c0_7, %c0_8, %c0_9] : memref<8x8x128xf32, #tpu.memory_space<vmem>>, vector<8x8x128xf32>
    tpu.vector_store %arg11[%c0_7, %c0_8, %c0_9], %10 {strides = array<i32>} : memref<8x8x128xf32, #tpu.memory_space<vmem>>, vector<8x8x128xf32>,
    %c0_i32_10 = arith.constant 0 : i32
    %12 = arith.index_cast %c0_i32_10 : i32 to index
    %c0_11 = arith.constant 0 : index
    %c0_12 = arith.constant 0 : index
    %13 = vector.load %arg11[%12, %c0_11, %c0_12] : memref<8x8x128xf32, #tpu.memory_space<vmem>>, vector<1x8x128xf32>
    %14 = vector.shape_cast %13 : vector<1x8x128xf32> to vector<8x128xf32>
    %c0_13 = arith.constant 0 : index
    %c0_14 = arith.constant 0 : index
    %15 = vector.load %arg10[%c0_13, %c0_14] : memref<8x128xf32, #tpu.memory_space<vmem>>, vector<8x128xf32>
    %cst_15 = arith.constant 0.899999976 : f32
    %16 = vector.broadcast %cst_15 : f32 to vector<8x128xf32>
    %17 = arith.mulf %16, %15 : vector<8x128xf32>
    %18 = arith.addf %17, %14 : vector<8x128xf32>
    %cst_16 = arith.constant 1.000000e+00 : f32
    %19 = vector.broadcast %cst_16 : f32 to vector<8x128xf32>
    %20 = arith.cmpf ogt, %18, %19 : vector<8x128xf32>
    %21 = arith.extui %20 : vector<8x128xi1> to vector<8x128xi32>
    %22 = arith.sitofp %21 : vector<8x128xi32> to vector<8x128xf32>
    %23 = arith.truncf %22 : vector<8x128xf32> to vector<8x128xbf16>
    %24 = arith.index_cast %c0_i32_10 : i32 to index
    %c0_17 = arith.constant 0 : index
    %c0_18 = arith.constant 0 : index
    %25 = vector.load %arg9[%24, %c0_17, %c0_18] : memref<8x8x128xf32, #tpu.memory_space<vmem>>, vector<1x8x128xf32>
    %26 = vector.shape_cast %25 : vector<1x8x128xf32> to vector<8x128xf32>
    %27 = vector.shape_cast %18 : vector<8x128xf32> to vector<1x8x128xf32>
    tpu.vector_store %arg9[%24, %c0_17, %c0_18], %27 {strides = array<i32>} : memref<8x8x128xf32, #tpu.memory_space<vmem>>, vector<1x8x128xf32>,
    %28 = arith.index_cast %c0_i32_10 : i32 to index
    %c0_19 = arith.constant 0 : index
    %c0_20 = arith.constant 0 : index
    %29 = vector.load %arg8[%28, %c0_19, %c0_20] : memref<8x8x128xbf16, #tpu.memory_space<vmem>>, vector<1x8x128xbf16>
    %30 = vector.shape_cast %29 : vector<1x8x128xbf16> to vector<8x128xbf16>
    %31 = vector.shape_cast %23 : vector<8x128xbf16> to vector<1x8x128xbf16>
    tpu.vector_store %arg8[%28, %c0_19, %c0_20], %31 {strides = array<i32>} : memref<8x8x128xbf16, #tpu.memory_space<vmem>>, vector<1x8x128xbf16>,
    %cst_21 = arith.constant 1.000000e+00 : f32
    %32 = vector.broadcast %cst_21 : f32 to vector<8x128xf32>
    %33 = arith.cmpf ogt, %18, %32 : vector<8x128xf32>
    %cst_22 = arith.constant 1.000000e+00 : f32
    %34 = vector.broadcast %cst_22 : f32 to vector<8x128xf32>
    %35 = arith.subf %18, %34 : vector<8x128xf32>
    %36 = arith.select %33, %35, %18 : vector<8x128xi1>, vector<8x128xf32>
    %c0_23 = arith.constant 0 : index
    %c0_24 = arith.constant 0 : index
    %37 = vector.load %arg10[%c0_23, %c0_24] : memref<8x128xf32, #tpu.memory_space<vmem>>, vector<8x128xf32>
    tpu.vector_store %arg10[%c0_23, %c0_24], %36 {strides = array<i32>} : memref<8x128xf32, #tpu.memory_space<vmem>>, vector<8x128xf32>,
    %c1_i32 = arith.constant 1 : i32
    %38 = arith.index_cast %c1_i32 : i32 to index
    %c0_25 = arith.constant 0 : index
    %c0_26 = arith.constant 0 : index
    %39 = vector.load %arg11[%38, %c0_25, %c0_26] : memref<8x8x128xf32, #tpu.memory_space<vmem>>, vector<1x8x128xf32>
    %40 = vector.shape_cast %39 : vector<1x8x128xf32> to vector<8x128xf32>
    %c0_27 = arith.constant 0 : index
    %c0_28 = arith.constant 0 : index
    %41 = vector.load %arg10[%c0_27, %c0_28] : memref<8x128xf32, #tpu.memory_space<vmem>>, vector<8x128xf32>
    %cst_29 = arith.constant 0.899999976 : f32
    %42 = vector.broadcast %cst_29 : f32 to vector<8x128xf32>
    %43 = arith.mulf %42, %41 : vector<8x128xf32>
    %44 = arith.addf %43, %40 : vector<8x128xf32>
    %cst_30 = arith.constant 1.000000e+00 : f32
    %45 = vector.broadcast %cst_30 : f32 to vector<8x128xf32>
    %46 = arith.cmpf ogt, %44, %45 : vector<8x128xf32>
    %47 = arith.extui %46 : vector<8x128xi1> to vector<8x128xi32>
    %48 = arith.sitofp %47 : vector<8x128xi32> to vector<8x128xf32>
    %49 = arith.truncf %48 : vector<8x128xf32> to vector<8x128xbf16>
    %50 = arith.index_cast %c1_i32 : i32 to index
    %c0_31 = arith.constant 0 : index
    %c0_32 = arith.constant 0 : index
    %51 = vector.load %arg9[%50, %c0_31, %c0_32] : memref<8x8x128xf32, #tpu.memory_space<vmem>>, vector<1x8x128xf32>
    %52 = vector.shape_cast %51 : vector<1x8x128xf32> to vector<8x128xf32>
    %53 = vector.shape_cast %44 : vector<8x128xf32> to vector<1x8x128xf32>
    tpu.vector_store %arg9[%50, %c0_31, %c0_32], %53 {strides = array<i32>} : memref<8x8x128xf32, #tpu.memory_space<vmem>>, vector<1x8x128xf32>,
    %54 = arith.index_cast %c1_i32 : i32 to index
    %c0_33 = arith.constant 0 : index
    %c0_34 = arith.constant 0 : index
    %55 = vector.load %arg8[%54, %c0_33, %c0_34] : memref<8x8x128xbf16, #tpu.memory_space<vmem>>, vector<1x8x128xbf16>
    %56 = vector.shape_cast %55 : vector<1x8x128xbf16> to vector<8x128xbf16>
    %57 = vector.shape_cast %49 : vector<8x128xbf16> to vector<1x8x128xbf16>
    tpu.vector_store %arg8[%54, %c0_33, %c0_34], %57 {strides = array<i32>} : memref<8x8x128xbf16, #tpu.memory_space<vmem>>, vector<1x8x128xbf16>,
    %cst_35 = arith.constant 1.000000e+00 : f32
    %58 = vector.broadcast %cst_35 : f32 to vector<8x128xf32>
    %59 = arith.cmpf ogt, %44, %58 : vector<8x128xf32>
    %cst_36 = arith.constant 1.000000e+00 : f32
    %60 = vector.broadcast %cst_36 : f32 to vector<8x128xf32>
    %61 = arith.subf %44, %60 : vector<8x128xf32>
    %62 = arith.select %59, %61, %44 : vector<8x128xi1>, vector<8x128xf32>
    %c0_37 = arith.constant 0 : index
    %c0_38 = arith.constant 0 : index
    %63 = vector.load %arg10[%c0_37, %c0_38] : memref<8x128xf32, #tpu.memory_space<vmem>>, vector<8x128xf32>
    tpu.vector_store %arg10[%c0_37, %c0_38], %62 {strides = array<i32>} : memref<8x128xf32, #tpu.memory_space<vmem>>, vector<8x128xf32>,
    %c2_i32 = arith.constant 2 : i32
    %64 = arith.index_cast %c2_i32 : i32 to index
    %c0_39 = arith.constant 0 : index
    %c0_40 = arith.constant 0 : index
    %65 = vector.load %arg11[%64, %c0_39, %c0_40] : memref<8x8x128xf32, #tpu.memory_space<vmem>>, vector<1x8x128xf32>
    %66 = vector.shape_cast %65 : vector<1x8x128xf32> to vector<8x128xf32>
    %c0_41 = arith.constant 0 : index
    %c0_42 = arith.constant 0 : index
    %67 = vector.load %arg10[%c0_41, %c0_42] : memref<8x128xf32, #tpu.memory_space<vmem>>, vector<8x128xf32>
    %cst_43 = arith.constant 0.899999976 : f32
    %68 = vector.broadcast %cst_43 : f32 to vector<8x128xf32>
    %69 = arith.mulf %68, %67 : vector<8x128xf32>
    %70 = arith.addf %69, %66 : vector<8x128xf32>
    %cst_44 = arith.constant 1.000000e+00 : f32
    %71 = vector.broadcast %cst_44 : f32 to vector<8x128xf32>
    %72 = arith.cmpf ogt, %70, %71 : vector<8x128xf32>
    %73 = arith.extui %72 : vector<8x128xi1> to vector<8x128xi32>
    %74 = arith.sitofp %73 : vector<8x128xi32> to vector<8x128xf32>
    %75 = arith.truncf %74 : vector<8x128xf32> to vector<8x128xbf16>
    %76 = arith.index_cast %c2_i32 : i32 to index
    %c0_45 = arith.constant 0 : index
    %c0_46 = arith.constant 0 : index
    %77 = vector.load %arg9[%76, %c0_45, %c0_46] : memref<8x8x128xf32, #tpu.memory_space<vmem>>, vector<1x8x128xf32>
    %78 = vector.shape_cast %77 : vector<1x8x128xf32> to vector<8x128xf32>
    %79 = vector.shape_cast %70 : vector<8x128xf32> to vector<1x8x128xf32>
    tpu.vector_store %arg9[%76, %c0_45, %c0_46], %79 {strides = array<i32>} : memref<8x8x128xf32, #tpu.memory_space<vmem>>, vector<1x8x128xf32>,
    %80 = arith.index_cast %c2_i32 : i32 to index
    %c0_47 = arith.constant 0 : index
    %c0_48 = arith.constant 0 : index
    %81 = vector.load %arg8[%80, %c0_47, %c0_48] : memref<8x8x128xbf16, #tpu.memory_space<vmem>>, vector<1x8x128xbf16>
    %82 = vector.shape_cast %81 : vector<1x8x128xbf16> to vector<8x128xbf16>
    %83 = vector.shape_cast %75 : vector<8x128xbf16> to vector<1x8x128xbf16>
    tpu.vector_store %arg8[%80, %c0_47, %c0_48], %83 {strides = array<i32>} : memref<8x8x128xbf16, #tpu.memory_space<vmem>>, vector<1x8x128xbf16>,
    %cst_49 = arith.constant 1.000000e+00 : f32
    %84 = vector.broadcast %cst_49 : f32 to vector<8x128xf32>
    %85 = arith.cmpf ogt, %70, %84 : vector<8x128xf32>
    %cst_50 = arith.constant 1.000000e+00 : f32
    %86 = vector.broadcast %cst_50 : f32 to vector<8x128xf32>
    %87 = arith.subf %70, %86 : vector<8x128xf32>
    %88 = arith.select %85, %87, %70 : vector<8x128xi1>, vector<8x128xf32>
    %c0_51 = arith.constant 0 : index
    %c0_52 = arith.constant 0 : index
    %89 = vector.load %arg10[%c0_51, %c0_52] : memref<8x128xf32, #tpu.memory_space<vmem>>, vector<8x128xf32>
    tpu.vector_store %arg10[%c0_51, %c0_52], %88 {strides = array<i32>} : memref<8x128xf32, #tpu.memory_space<vmem>>, vector<8x128xf32>,
    %c3_i32 = arith.constant 3 : i32
    %90 = arith.index_cast %c3_i32 : i32 to index
    %c0_53 = arith.constant 0 : index
    %c0_54 = arith.constant 0 : index
    %91 = vector.load %arg11[%90, %c0_53, %c0_54] : memref<8x8x128xf32, #tpu.memory_space<vmem>>, vector<1x8x128xf32>
    %92 = vector.shape_cast %91 : vector<1x8x128xf32> to vector<8x128xf32>
    %c0_55 = arith.constant 0 : index
    %c0_56 = arith.constant 0 : index
    %93 = vector.load %arg10[%c0_55, %c0_56] : memref<8x128xf32, #tpu.memory_space<vmem>>, vector<8x128xf32>
    %cst_57 = arith.constant 0.899999976 : f32
    %94 = vector.broadcast %cst_57 : f32 to vector<8x128xf32>
    %95 = arith.mulf %94, %93 : vector<8x128xf32>
    %96 = arith.addf %95, %92 : vector<8x128xf32>
    %cst_58 = arith.constant 1.000000e+00 : f32
    %97 = vector.broadcast %cst_58 : f32 to vector<8x128xf32>
    %98 = arith.cmpf ogt, %96, %97 : vector<8x128xf32>
    %99 = arith.extui %98 : vector<8x128xi1> to vector<8x128xi32>
    %100 = arith.sitofp %99 : vector<8x128xi32> to vector<8x128xf32>
    %101 = arith.truncf %100 : vector<8x128xf32> to vector<8x128xbf16>
    %102 = arith.index_cast %c3_i32 : i32 to index
    %c0_59 = arith.constant 0 : index
    %c0_60 = arith.constant 0 : index
    %103 = vector.load %arg9[%102, %c0_59, %c0_60] : memref<8x8x128xf32, #tpu.memory_space<vmem>>, vector<1x8x128xf32>
    %104 = vector.shape_cast %103 : vector<1x8x128xf32> to vector<8x128xf32>
    %105 = vector.shape_cast %96 : vector<8x128xf32> to vector<1x8x128xf32>
    tpu.vector_store %arg9[%102, %c0_59, %c0_60], %105 {strides = array<i32>} : memref<8x8x128xf32, #tpu.memory_space<vmem>>, vector<1x8x128xf32>,
    %106 = arith.index_cast %c3_i32 : i32 to index
    %c0_61 = arith.constant 0 : index
    %c0_62 = arith.constant 0 : index
    %107 = vector.load %arg8[%106, %c0_61, %c0_62] : memref<8x8x128xbf16, #tpu.memory_space<vmem>>, vector<1x8x128xbf16>
    %108 = vector.shape_cast %107 : vector<1x8x128xbf16> to vector<8x128xbf16>
    %109 = vector.shape_cast %101 : vector<8x128xbf16> to vector<1x8x128xbf16>
    tpu.vector_store %arg8[%106, %c0_61, %c0_62], %109 {strides = array<i32>} : memref<8x8x128xbf16, #tpu.memory_space<vmem>>, vector<1x8x128xbf16>,
    %cst_63 = arith.constant 1.000000e+00 : f32
    %110 = vector.broadcast %cst_63 : f32 to vector<8x128xf32>
    %111 = arith.cmpf ogt, %96, %110 : vector<8x128xf32>
    %cst_64 = arith.constant 1.000000e+00 : f32
    %112 = vector.broadcast %cst_64 : f32 to vector<8x128xf32>
    %113 = arith.subf %96, %112 : vector<8x128xf32>
    %114 = arith.select %111, %113, %96 : vector<8x128xi1>, vector<8x128xf32>
    %c0_65 = arith.constant 0 : index
    %c0_66 = arith.constant 0 : index
    %115 = vector.load %arg10[%c0_65, %c0_66] : memref<8x128xf32, #tpu.memory_space<vmem>>, vector<8x128xf32>
    tpu.vector_store %arg10[%c0_65, %c0_66], %114 {strides = array<i32>} : memref<8x128xf32, #tpu.memory_space<vmem>>, vector<8x128xf32>,
    %c4_i32 = arith.constant 4 : i32
    %116 = arith.index_cast %c4_i32 : i32 to index
    %c0_67 = arith.constant 0 : index
    %c0_68 = arith.constant 0 : index
    %117 = vector.load %arg11[%116, %c0_67, %c0_68] : memref<8x8x128xf32, #tpu.memory_space<vmem>>, vector<1x8x128xf32>
    %118 = vector.shape_cast %117 : vector<1x8x128xf32> to vector<8x128xf32>
    %c0_69 = arith.constant 0 : index
    %c0_70 = arith.constant 0 : index
    %119 = vector.load %arg10[%c0_69, %c0_70] : memref<8x128xf32, #tpu.memory_space<vmem>>, vector<8x128xf32>
    %cst_71 = arith.constant 0.899999976 : f32
    %120 = vector.broadcast %cst_71 : f32 to vector<8x128xf32>
    %121 = arith.mulf %120, %119 : vector<8x128xf32>
    %122 = arith.addf %121, %118 : vector<8x128xf32>
    %cst_72 = arith.constant 1.000000e+00 : f32
    %123 = vector.broadcast %cst_72 : f32 to vector<8x128xf32>
    %124 = arith.cmpf ogt, %122, %123 : vector<8x128xf32>
    %125 = arith.extui %124 : vector<8x128xi1> to vector<8x128xi32>
    %126 = arith.sitofp %125 : vector<8x128xi32> to vector<8x128xf32>
    %127 = arith.truncf %126 : vector<8x128xf32> to vector<8x128xbf16>
    %128 = arith.index_cast %c4_i32 : i32 to index
    %c0_73 = arith.constant 0 : index
    %c0_74 = arith.constant 0 : index
    %129 = vector.load %arg9[%128, %c0_73, %c0_74] : memref<8x8x128xf32, #tpu.memory_space<vmem>>, vector<1x8x128xf32>
    %130 = vector.shape_cast %129 : vector<1x8x128xf32> to vector<8x128xf32>
    %131 = vector.shape_cast %122 : vector<8x128xf32> to vector<1x8x128xf32>
    tpu.vector_store %arg9[%128, %c0_73, %c0_74], %131 {strides = array<i32>} : memref<8x8x128xf32, #tpu.memory_space<vmem>>, vector<1x8x128xf32>,
    %132 = arith.index_cast %c4_i32 : i32 to index
    %c0_75 = arith.constant 0 : index
    %c0_76 = arith.constant 0 : index
    %133 = vector.load %arg8[%132, %c0_75, %c0_76] : memref<8x8x128xbf16, #tpu.memory_space<vmem>>, vector<1x8x128xbf16>
    %134 = vector.shape_cast %133 : vector<1x8x128xbf16> to vector<8x128xbf16>
    %135 = vector.shape_cast %127 : vector<8x128xbf16> to vector<1x8x128xbf16>
    tpu.vector_store %arg8[%132, %c0_75, %c0_76], %135 {strides = array<i32>} : memref<8x8x128xbf16, #tpu.memory_space<vmem>>, vector<1x8x128xbf16>,
    %cst_77 = arith.constant 1.000000e+00 : f32
    %136 = vector.broadcast %cst_77 : f32 to vector<8x128xf32>
    %137 = arith.cmpf ogt, %122, %136 : vector<8x128xf32>
    %cst_78 = arith.constant 1.000000e+00 : f32
    %138 = vector.broadcast %cst_78 : f32 to vector<8x128xf32>
    %139 = arith.subf %122, %138 : vector<8x128xf32>
    %140 = arith.select %137, %139, %122 : vector<8x128xi1>, vector<8x128xf32>
    %c0_79 = arith.constant 0 : index
    %c0_80 = arith.constant 0 : index
    %141 = vector.load %arg10[%c0_79, %c0_80] : memref<8x128xf32, #tpu.memory_space<vmem>>, vector<8x128xf32>
    tpu.vector_store %arg10[%c0_79, %c0_80], %140 {strides = array<i32>} : memref<8x128xf32, #tpu.memory_space<vmem>>, vector<8x128xf32>,
    %c5_i32 = arith.constant 5 : i32
    %142 = arith.index_cast %c5_i32 : i32 to index
    %c0_81 = arith.constant 0 : index
    %c0_82 = arith.constant 0 : index
    %143 = vector.load %arg11[%142, %c0_81, %c0_82] : memref<8x8x128xf32, #tpu.memory_space<vmem>>, vector<1x8x128xf32>
    %144 = vector.shape_cast %143 : vector<1x8x128xf32> to vector<8x128xf32>
    %c0_83 = arith.constant 0 : index
    %c0_84 = arith.constant 0 : index
    %145 = vector.load %arg10[%c0_83, %c0_84] : memref<8x128xf32, #tpu.memory_space<vmem>>, vector<8x128xf32>
    %cst_85 = arith.constant 0.899999976 : f32
    %146 = vector.broadcast %cst_85 : f32 to vector<8x128xf32>
    %147 = arith.mulf %146, %145 : vector<8x128xf32>
    %148 = arith.addf %147, %144 : vector<8x128xf32>
    %cst_86 = arith.constant 1.000000e+00 : f32
    %149 = vector.broadcast %cst_86 : f32 to vector<8x128xf32>
    %150 = arith.cmpf ogt, %148, %149 : vector<8x128xf32>
    %151 = arith.extui %150 : vector<8x128xi1> to vector<8x128xi32>
    %152 = arith.sitofp %151 : vector<8x128xi32> to vector<8x128xf32>
    %153 = arith.truncf %152 : vector<8x128xf32> to vector<8x128xbf16>
    %154 = arith.index_cast %c5_i32 : i32 to index
    %c0_87 = arith.constant 0 : index
    %c0_88 = arith.constant 0 : index
    %155 = vector.load %arg9[%154, %c0_87, %c0_88] : memref<8x8x128xf32, #tpu.memory_space<vmem>>, vector<1x8x128xf32>
    %156 = vector.shape_cast %155 : vector<1x8x128xf32> to vector<8x128xf32>
    %157 = vector.shape_cast %148 : vector<8x128xf32> to vector<1x8x128xf32>
    tpu.vector_store %arg9[%154, %c0_87, %c0_88], %157 {strides = array<i32>} : memref<8x8x128xf32, #tpu.memory_space<vmem>>, vector<1x8x128xf32>,
    %158 = arith.index_cast %c5_i32 : i32 to index
    %c0_89 = arith.constant 0 : index
    %c0_90 = arith.constant 0 : index
    %159 = vector.load %arg8[%158, %c0_89, %c0_90] : memref<8x8x128xbf16, #tpu.memory_space<vmem>>, vector<1x8x128xbf16>
    %160 = vector.shape_cast %159 : vector<1x8x128xbf16> to vector<8x128xbf16>
    %161 = vector.shape_cast %153 : vector<8x128xbf16> to vector<1x8x128xbf16>
    tpu.vector_store %arg8[%158, %c0_89, %c0_90], %161 {strides = array<i32>} : memref<8x8x128xbf16, #tpu.memory_space<vmem>>, vector<1x8x128xbf16>,
    %cst_91 = arith.constant 1.000000e+00 : f32
    %162 = vector.broadcast %cst_91 : f32 to vector<8x128xf32>
    %163 = arith.cmpf ogt, %148, %162 : vector<8x128xf32>
    %cst_92 = arith.constant 1.000000e+00 : f32
    %164 = vector.broadcast %cst_92 : f32 to vector<8x128xf32>
    %165 = arith.subf %148, %164 : vector<8x128xf32>
    %166 = arith.select %163, %165, %148 : vector<8x128xi1>, vector<8x128xf32>
    %c0_93 = arith.constant 0 : index
    %c0_94 = arith.constant 0 : index
    %167 = vector.load %arg10[%c0_93, %c0_94] : memref<8x128xf32, #tpu.memory_space<vmem>>, vector<8x128xf32>
    tpu.vector_store %arg10[%c0_93, %c0_94], %166 {strides = array<i32>} : memref<8x128xf32, #tpu.memory_space<vmem>>, vector<8x128xf32>,
    %c6_i32 = arith.constant 6 : i32
    %168 = arith.index_cast %c6_i32 : i32 to index
    %c0_95 = arith.constant 0 : index
    %c0_96 = arith.constant 0 : index
    %169 = vector.load %arg11[%168, %c0_95, %c0_96] : memref<8x8x128xf32, #tpu.memory_space<vmem>>, vector<1x8x128xf32>
    %170 = vector.shape_cast %169 : vector<1x8x128xf32> to vector<8x128xf32>
    %c0_97 = arith.constant 0 : index
    %c0_98 = arith.constant 0 : index
    %171 = vector.load %arg10[%c0_97, %c0_98] : memref<8x128xf32, #tpu.memory_space<vmem>>, vector<8x128xf32>
    %cst_99 = arith.constant 0.899999976 : f32
    %172 = vector.broadcast %cst_99 : f32 to vector<8x128xf32>
    %173 = arith.mulf %172, %171 : vector<8x128xf32>
    %174 = arith.addf %173, %170 : vector<8x128xf32>
    %cst_100 = arith.constant 1.000000e+00 : f32
    %175 = vector.broadcast %cst_100 : f32 to vector<8x128xf32>
    %176 = arith.cmpf ogt, %174, %175 : vector<8x128xf32>
    %177 = arith.extui %176 : vector<8x128xi1> to vector<8x128xi32>
    %178 = arith.sitofp %177 : vector<8x128xi32> to vector<8x128xf32>
    %179 = arith.truncf %178 : vector<8x128xf32> to vector<8x128xbf16>
    %180 = arith.index_cast %c6_i32 : i32 to index
    %c0_101 = arith.constant 0 : index
    %c0_102 = arith.constant 0 : index
    %181 = vector.load %arg9[%180, %c0_101, %c0_102] : memref<8x8x128xf32, #tpu.memory_space<vmem>>, vector<1x8x128xf32>
    %182 = vector.shape_cast %181 : vector<1x8x128xf32> to vector<8x128xf32>
    %183 = vector.shape_cast %174 : vector<8x128xf32> to vector<1x8x128xf32>
    tpu.vector_store %arg9[%180, %c0_101, %c0_102], %183 {strides = array<i32>} : memref<8x8x128xf32, #tpu.memory_space<vmem>>, vector<1x8x128xf32>,
    %184 = arith.index_cast %c6_i32 : i32 to index
    %c0_103 = arith.constant 0 : index
    %c0_104 = arith.constant 0 : index
    %185 = vector.load %arg8[%184, %c0_103, %c0_104] : memref<8x8x128xbf16, #tpu.memory_space<vmem>>, vector<1x8x128xbf16>
    %186 = vector.shape_cast %185 : vector<1x8x128xbf16> to vector<8x128xbf16>
    %187 = vector.shape_cast %179 : vector<8x128xbf16> to vector<1x8x128xbf16>
    tpu.vector_store %arg8[%184, %c0_103, %c0_104], %187 {strides = array<i32>} : memref<8x8x128xbf16, #tpu.memory_space<vmem>>, vector<1x8x128xbf16>,
    %cst_105 = arith.constant 1.000000e+00 : f32
    %188 = vector.broadcast %cst_105 : f32 to vector<8x128xf32>
    %189 = arith.cmpf ogt, %174, %188 : vector<8x128xf32>
    %cst_106 = arith.constant 1.000000e+00 : f32
    %190 = vector.broadcast %cst_106 : f32 to vector<8x128xf32>
    %191 = arith.subf %174, %190 : vector<8x128xf32>
    %192 = arith.select %189, %191, %174 : vector<8x128xi1>, vector<8x128xf32>
    %c0_107 = arith.constant 0 : index
    %c0_108 = arith.constant 0 : index
    %193 = vector.load %arg10[%c0_107, %c0_108] : memref<8x128xf32, #tpu.memory_space<vmem>>, vector<8x128xf32>
    tpu.vector_store %arg10[%c0_107, %c0_108], %192 {strides = array<i32>} : memref<8x128xf32, #tpu.memory_space<vmem>>, vector<8x128xf32>,
    %c7_i32 = arith.constant 7 : i32
    %194 = arith.index_cast %c7_i32 : i32 to index
    %c0_109 = arith.constant 0 : index
    %c0_110 = arith.constant 0 : index
    %195 = vector.load %arg11[%194, %c0_109, %c0_110] : memref<8x8x128xf32, #tpu.memory_space<vmem>>, vector<1x8x128xf32>
    %196 = vector.shape_cast %195 : vector<1x8x128xf32> to vector<8x128xf32>
    %c0_111 = arith.constant 0 : index
    %c0_112 = arith.constant 0 : index
    %197 = vector.load %arg10[%c0_111, %c0_112] : memref<8x128xf32, #tpu.memory_space<vmem>>, vector<8x128xf32>
    %cst_113 = arith.constant 0.899999976 : f32
    %198 = vector.broadcast %cst_113 : f32 to vector<8x128xf32>
    %199 = arith.mulf %198, %197 : vector<8x128xf32>
    %200 = arith.addf %199, %196 : vector<8x128xf32>
    %cst_114 = arith.constant 1.000000e+00 : f32
    %201 = vector.broadcast %cst_114 : f32 to vector<8x128xf32>
    %202 = arith.cmpf ogt, %200, %201 : vector<8x128xf32>
    %203 = arith.extui %202 : vector<8x128xi1> to vector<8x128xi32>
    %204 = arith.sitofp %203 : vector<8x128xi32> to vector<8x128xf32>
    %205 = arith.truncf %204 : vector<8x128xf32> to vector<8x128xbf16>
    %206 = arith.index_cast %c7_i32 : i32 to index
    %c0_115 = arith.constant 0 : index
    %c0_116 = arith.constant 0 : index
    %207 = vector.load %arg9[%206, %c0_115, %c0_116] : memref<8x8x128xf32, #tpu.memory_space<vmem>>, vector<1x8x128xf32>
    %208 = vector.shape_cast %207 : vector<1x8x128xf32> to vector<8x128xf32>
    %209 = vector.shape_cast %200 : vector<8x128xf32> to vector<1x8x128xf32>
    tpu.vector_store %arg9[%206, %c0_115, %c0_116], %209 {strides = array<i32>} : memref<8x8x128xf32, #tpu.memory_space<vmem>>, vector<1x8x128xf32>,
    %210 = arith.index_cast %c7_i32 : i32 to index
    %c0_117 = arith.constant 0 : index
    %c0_118 = arith.constant 0 : index
    %211 = vector.load %arg8[%210, %c0_117, %c0_118] : memref<8x8x128xbf16, #tpu.memory_space<vmem>>, vector<1x8x128xbf16>
    %212 = vector.shape_cast %211 : vector<1x8x128xbf16> to vector<8x128xbf16>
    %213 = vector.shape_cast %205 : vector<8x128xbf16> to vector<1x8x128xbf16>
    tpu.vector_store %arg8[%210, %c0_117, %c0_118], %213 {strides = array<i32>} : memref<8x8x128xbf16, #tpu.memory_space<vmem>>, vector<1x8x128xbf16>,
    %cst_119 = arith.constant 1.000000e+00 : f32
    %214 = vector.broadcast %cst_119 : f32 to vector<8x128xf32>
    %215 = arith.cmpf ogt, %200, %214 : vector<8x128xf32>
    %cst_120 = arith.constant 1.000000e+00 : f32
    %216 = vector.broadcast %cst_120 : f32 to vector<8x128xf32>
    %217 = arith.subf %200, %216 : vector<8x128xf32>
    %218 = arith.select %215, %217, %200 : vector<8x128xi1>, vector<8x128xf32>
    %c0_121 = arith.constant 0 : index
    %c0_122 = arith.constant 0 : index
    %219 = vector.load %arg10[%c0_121, %c0_122] : memref<8x128xf32, #tpu.memory_space<vmem>>, vector<8x128xf32>
    tpu.vector_store %arg10[%c0_121, %c0_122], %218 {strides = array<i32>} : memref<8x128xf32, #tpu.memory_space<vmem>>, vector<8x128xf32>,
    %c8_i32 = arith.constant 8 : i32
    %c0_123 = arith.constant 0 : index
    %c0_124 = arith.constant 0 : index
    %c0_125 = arith.constant 0 : index
    %220 = vector.load %arg8[%c0_123, %c0_124, %c0_125] : memref<8x8x128xbf16, #tpu.memory_space<vmem>>, vector<8x8x128xbf16>
    %221 = vector.shape_cast %220 : vector<8x8x128xbf16> to vector<64x128xbf16>
    %c0_126 = arith.constant 0 : index
    %c0_127 = arith.constant 0 : index
    %222 = vector.load %arg5[%c0_126, %c0_127] : memref<128x128xbf16, #tpu.memory_space<vmem>>, vector<128x128xbf16>
    %cst_128 = arith.constant dense<0.000000e+00> : vector<64x128xf32>
    %223 = tpu.matmul %221, %222, %cst_128 {dimension_numbers = #tpu.dot_dimension_numbers<[1], [0], [0], [1], [0, 0, 1, 1], [], []>} : vector<64x128xbf16>, vector<128x128xbf16>, vector<64x128xf32> -> vector<64x128xf32>
    %c0_129 = arith.constant 0 : index
    %c0_130 = arith.constant 0 : index
    %224 = vector.load %arg6[%c0_129, %c0_130] : memref<1x128xf32, #tpu.memory_space<vmem>>, vector<1x128xf32>
    %225 = vector.broadcast %224 : vector<1x128xf32> to vector<64x128xf32>
    %226 = arith.addf %223, %225 : vector<64x128xf32>
    %227 = vector.shape_cast %226 : vector<64x128xf32> to vector<8x8x128xf32>
    %c0_131 = arith.constant 0 : index
    %c0_132 = arith.constant 0 : index
    %c0_133 = arith.constant 0 : index
    %228 = vector.load %arg7[%c0_131, %c0_132, %c0_133] : memref<8x8x128xf32, #tpu.memory_space<vmem>>, vector<8x8x128xf32>
    tpu.vector_store %arg7[%c0_131, %c0_132, %c0_133], %227 {strides = array<i32>} : memref<8x8x128xf32, #tpu.memory_space<vmem>>, vector<8x8x128xf32>,
    return
  }
  func.func @transform_0(%arg0: i32, %arg1: i32) -> (i32, i32, i32) {
    %c0_i32 = arith.constant 0 : i32
    %c0_i32_0 = arith.constant 0 : i32
    return %arg1, %arg0, %c0_i32 : i32, i32, i32
  }
  func.func @transform_1(%arg0: i32, %arg1: i32) -> (i32, i32) {
    %c0_i32 = arith.constant 0 : i32
    %c0_i32_0 = arith.constant 0 : i32
    %c0_i32_1 = arith.constant 0 : i32
    return %c0_i32, %c0_i32_0 : i32, i32
  }
  func.func @transform_2(%arg0: i32, %arg1: i32) -> (i32, i32) {
    %c0_i32 = arith.constant 0 : i32
    %c0_i32_0 = arith.constant 0 : i32
    %c0_i32_1 = arith.constant 0 : i32
    return %c0_i32, %c0_i32_0 : i32, i32
  }
  func.func @transform_3(%arg0: i32, %arg1: i32) -> (i32, i32) {
    %c0_i32 = arith.constant 0 : i32
    %c0_i32_0 = arith.constant 0 : i32
    %c0_i32_1 = arith.constant 0 : i32
    return %c0_i32, %c0_i32_0 : i32, i32
  }
  func.func @transform_4(%arg0: i32, %arg1: i32) -> (i32, i32) {
    %c0_i32 = arith.constant 0 : i32
    %c0_i32_0 = arith.constant 0 : i32
    %c0_i32_1 = arith.constant 0 : i32
    return %c0_i32, %c0_i32_0 : i32, i32
  }
  func.func @transform_5(%arg0: i32, %arg1: i32) -> (i32, i32, i32) {
    %c0_i32 = arith.constant 0 : i32
    %c0_i32_0 = arith.constant 0 : i32
    return %arg1, %arg0, %c0_i32 : i32, i32, i32
  }
  func.func @transform_6(%arg0: i32, %arg1: i32) -> (i32, i32, i32) {
    %c0_i32 = arith.constant 0 : i32
    %c0_i32_0 = arith.constant 0 : i32
    return %arg1, %arg0, %c0_i32 : i32, i32, i32
  }
  func.func @transform_7(%arg0: i32, %arg1: i32) -> (i32, i32, i32) {
    %c0_i32 = arith.constant 0 : i32
    %c0_i32_0 = arith.constant 0 : i32
    return %arg1, %arg0, %c0_i32 : i32, i32, i32
  }
}

</mosaic_0001>

<bundles_post_ra>
// kernel: tpu_custom_call.1
= control target key start
LH: loop header
LB: loop body
LE: loop exit
PB: predicated region body
PF: predicated region fallthrough
CT: control target
= control target key end

     0   :  { %13 = vsyncpa [#allocation5], 0  ;;  %s986_s0 = inlined_call_operand.hbm [shape: bf16[8,8,128], index: 0, kind: input, shape index: {}]   ;;  %s987_s1 = inlined_call_operand.hbm [shape: bf16[128,128], index: 1, kind: input, shape index: {}]   ;;  %s988_s2 = inlined_call_operand.vmem [shape: f32[1,128], index: 2, kind: input, shape index: {}]   ;;  %s989_s3 = inlined_call_operand.hbm [shape: bf16[128,128], index: 3, kind: input, shape index: {}]   ;;  %s990_s4 = inlined_call_operand.vmem [shape: f32[1,128], index: 4, kind: input, shape index: {}]   ;;  %s991_s5 = inlined_call_operand.hbm [shape: f32[8,8,128], index: 5, kind: output, shape index: {0}]   ;;  %s992_s6 = inlined_call_operand.hbm [shape: bf16[8,8,128], index: 6, kind: output, shape index: {1}]   ;;  %s993_s7 = inlined_call_operand.hbm [shape: f32[8,8,128], index: 7, kind: output, shape index: {2}]  }
   0x1   :  { %14 = vsyncpa [#allocation8], 0 }
   0x2   :  { %15 = vsyncpa [#allocation6], 0 }
   0x3   :  { %16 = vsyncpa [#allocation12], 0  ;;  %s875_s24 = smov [#allocation7]   ;;  %s876_s26 = smov [#allocation4]  }
   0x4   :  { %s34_s25 = sshll.u32 %s875_s24, 4  ;;  %s22_s27 = sshll.u32 %s876_s26, 4  ;;  %s35_s25 = int_to_ptr.vmem [resolvable:$true] %s34_s25  ;;  %s23_s27 = int_to_ptr.vmem [resolvable:$true] %s22_s27 }
   0x5   :  { %s755_s28 = scalar_lea.vmem %s35_s25, 1024  ;;  %p760_p1 = scmp.lt.s32.totalorder %s35_s25, %s35_s25 }
   0x6   :  { %p756_p0 = scmp.ne.s32.totalorder %s35_s25, %s755_s28  ;;  %p761_p2 = scmp.lt.s32.totalorder %s755_s28, %s755_s28 }
   0x8   :  { %p762_p3 = por %p761_p2, %p760_p1 }
   0xa   :  { %p763_p4 = pnand %p762_p3, %p756_p0 }
   0xc   :  { %766 = shalt.err (!%p763_p4)
}
   0xd   :  { %s877_s29 = smov 64   ;;  %s878_s30 = smov 4  }
   0xe   :  { %40 = dma.hbm_to_vmem [thread:$0]  %s987_s1, 1024, %s35_s25, [#allocation8], %s877_s29, %s877_s29, %s878_s30  }
   0xf   :  { %s775_s10 = scalar_lea.vmem %s23_s27, 512  ;;  %p780_p6 = scmp.lt.s32.totalorder %s23_s27, %s23_s27 }
  0x10   :  { %p776_p5 = scmp.ne.s32.totalorder %s23_s27, %s775_s10  ;;  %p781_p7 = scmp.lt.s32.totalorder %s775_s10, %s775_s10 }
  0x12   :  { %p782_p8 = por %p781_p7, %p780_p6 }
  0x14   :  { %p783_p9 = pnand %p782_p8, %p776_p5 }
  0x16   :  { %786 = shalt.err (!%p783_p9)
}
  0x17   :  { %28 = dma.hbm_to_vmem [thread:$0]  %s986_s0, 512, %s23_s27, [#allocation5], %s877_s29, %s877_s29, %s878_s30  }
  0x18   :  { %s879_s13 = smov [#allocation9]  }
  0x19   :  { %s48_s14 = sshll.u32 %s879_s13, 4  ;;  %s49_s14 = int_to_ptr.vmem [resolvable:$true] %s48_s14 }
  0x1a   :  { %s795_s15 = scalar_lea.vmem %s49_s14, 1024  ;;  %p800_p11 = scmp.lt.s32.totalorder %s49_s14, %s49_s14 }
  0x1b   :  { %p796_p10 = scmp.ne.s32.totalorder %s49_s14, %s795_s15  ;;  %p801_p12 = scmp.lt.s32.totalorder %s795_s15, %s795_s15 }
  0x1d   :  { %p802_p13 = por %p801_p12, %p800_p11 }
  0x1f   :  { %p803_p0 = pnand %p802_p13, %p796_p10 }
  0x21   :  { %806 = shalt.err (!%p803_p0)
}
  0x22   :  { %54 = dma.hbm_to_vmem [thread:$0]  %s989_s3, 1024, %s49_s14, [#allocation8], %s877_s29, %s877_s29, %s878_s30  }
  0x23   :  { %867 = dma.done.wait [#allocation5], 512  }
  0x24   :  { %868 = vsyncadd [#allocation5], 4294966784 }
  0x25   :  { %869 = dma.done.wait [#allocation8], 2048  }
  0x26   :  { %870 = vsyncadd [#allocation8], 4294965248  ;;  %v723_v0 = vld [vmem:[#allocation7 + $0x38] sm:$0xff]   ;;  %v724_v1 = vld [vmem:[#allocation7 + $0x30] sm:$0xff]   ;;  %v880_v27 = vmov 0.0  }
  0x27   :  { %664 = vmatprep.subr.bf16.mxu0 %v723_v0  ;;  %v725_v2 = vld [vmem:[#allocation7 + $0x28] sm:$0xff]   ;;  %v726_v3 = vld [vmem:[#allocation7 + $0x20] sm:$0xff]   ;;  %v727_v5 = vld [vmem:[#allocation7 + $0x18] sm:$0xff]  }
  0x28   :  { %665 = vmatpush3.bf16.msra.mxu0 %v723_v0  ;;  %v731_v4 = vld [vmem:[#allocation4] sm:$0xff]   ;;  %v728_v6 = vld [vmem:[#allocation7 + $0x10] sm:$0xff]   ;;  %v729_v7 = vld [vmem:[#allocation7 + $0x8] sm:$0xff]  }
  0x29   :  { %666 = vmatprep.subr.bf16.mxu0 %v724_v1  ;;  %680 = vmatprep.mubr.bf16.mxu0 %v731_v4  ;;  %v730_v8 = vld [vmem:[#allocation7] sm:$0xff]   ;;  %v732_v9 = vld [vmem:[#allocation4 + $0x8] sm:$0xff]   ;;  %v733_v10 = vld [vmem:[#allocation4 + $0x10] sm:$0xff]  }
  0x2a   :  { %v734_v11 = vld [vmem:[#allocation4 + $0x18] sm:$0xff]   ;;  %v736_v13 = vld [vmem:[#allocation9 + $0x30] sm:$0xff]   ;;  %v737_v14 = vld [vmem:[#allocation9 + $0x28] sm:$0xff]  }
  0x2b   :  { %v735_v12 = vld [vmem:[#allocation9 + $0x38] sm:$0xff]   ;;  %v738_v15 = vld [vmem:[#allocation9 + $0x20] sm:$0xff]   ;;  %v741_v17 = vld [vmem:[#allocation9 + $0x10] sm:$0xff]  }
  0x2c   :  { %667 = vmatpush3.bf16.msra.mxu0 %v724_v1  ;;  %688 = vmatprep.subr.bf16.mxu1 %v735_v12  ;;  %v739_v16 = vld [vmem:[#allocation9 + $0x18] sm:$0xff]   ;;  %v742_v18 = vld [vmem:[#allocation9 + $0x8] sm:$0xff]   ;;  %v743_v19 = vld [vmem:[#allocation9] sm:$0xff]  }
  0x2d   :  { %668 = vmatprep.subr.bf16.mxu0 %v725_v2  ;;  %689 = vmatpush3.bf16.msra.mxu1 %v735_v12  ;;  %v947_v21 = vld [vmem:[%s988_s2] ss:$0 sm:$0xff]  ;;  %s881_s2 = smov [#allocation11]  }
  0x2e   :  { %690 = vmatprep.subr.bf16.mxu1 %v736_v13  ;;  %s566_s17 = sshll.u32 %s881_s2, 4  ;;  %s567_s17 = int_to_ptr.vmem [resolvable:$true] %s566_s17 }
  0x2f   :  { %s807_s18 = scalar_lea.vmem %s567_s17, 512  ;;  %p812_p2 = scmp.lt.s32.totalorder %s567_s17, %s567_s17 }
  0x30   :  { %669 = vmatpush3.bf16.msra.mxu0 %v725_v2  ;;  %p808_p1 = scmp.ne.s32.totalorder %s567_s17, %s807_s18  ;;  %p813_p3 = scmp.lt.s32.totalorder %s807_s18, %s807_s18 }
  0x31   :  { %670 = vmatprep.subr.bf16.mxu0 %v726_v3  ;;  %691 = vmatpush3.bf16.msra.mxu1 %v736_v13 }
  0x32   :  { %692 = vmatprep.subr.bf16.mxu1 %v737_v14  ;;  %p814_p4 = por %p813_p3, %p812_p2 }
  0x34   :  { %671 = vmatpush3.bf16.msra.mxu0 %v726_v3  ;;  %p815_p5 = pnand %p814_p4, %p808_p1 }
  0x35   :  { %672 = vmatprep.subr.bf16.mxu0 %v727_v5  ;;  %693 = vmatpush3.bf16.msra.mxu1 %v737_v14 }
  0x36   :  { %694 = vmatprep.subr.bf16.mxu1 %v738_v15 }
  0x38   :  { %673 = vmatpush3.bf16.msra.mxu0 %v727_v5 }
  0x39   :  { %674 = vmatprep.subr.bf16.mxu0 %v728_v6  ;;  %695 = vmatpush3.bf16.msra.mxu1 %v738_v15 }
  0x3a   :  { %696 = vmatprep.subr.bf16.mxu1 %v739_v16 }
  0x3c   :  { %675 = vmatpush3.bf16.msra.mxu0 %v728_v6 }
  0x3d   :  { %676 = vmatprep.subr.bf16.mxu0 %v729_v7  ;;  %697 = vmatpush3.bf16.msra.mxu1 %v739_v16 }
  0x3e   :  { %698 = vmatprep.subr.bf16.mxu1 %v741_v17 }
  0x40   :  { %677 = vmatpush3.bf16.msra.mxu0 %v729_v7 }
  0x41   :  { %678 = vmatprep.subr.bf16.mxu0 %v730_v8  ;;  %699 = vmatpush3.bf16.msra.mxu1 %v741_v17 }
  0x42   :  { %700 = vmatprep.subr.bf16.mxu1 %v742_v18 }
  0x44   :  { %679 = vmatpush3.bf16.msra.mxu0 %v730_v8 }
  0x45   :  { %701 = vmatpush3.bf16.msra.mxu1 %v742_v18 }
  0x46   :  { %702 = vmatprep.subr.bf16.mxu1 %v743_v19 }
  0x47   :  { %681 = vmatmul.mubr.bf16.vlgmr.msra.gmra.mxu0 %v732_v9 }
  0x48   :  { %684 = vmatprep.mubr.bf16.mxu0 %v733_v10 }
  0x49   :  { %703 = vmatpush3.bf16.msra.mxu1 %v743_v19 }
  0x4f   :  { %685 = vmatmul.mubr.bf16.gmra.mxu0 %v734_v11 }
 0x107   :  { %v682_v20 = vpop.f32.mrf.mxu0 }
 0x108   :  { %v218_v38 = vadd.f32 %v682_v20, %v947_v21 }
 0x109   :  { %v209_v22 = vpop.f32.mrf.mxu0 }
 0x10a   :  { %v210_v23 = vadd.f32 %v947_v21, %v209_v22 }
 0x10b   :  { %v683_v24 = vpop.f32.mrf.mxu0 }
 0x10c   :  { %256 = vst [vmem:[#allocation13] sm:$0xff] %v210_v23  ;;  %v612_v25 = vadd.f32 -1.0, %v210_v23  ;;  %vm252_vm0 = vcmp.gt.f32.partialorder %v210_v23, 1.0  ;;  %v221_v46 = vadd.f32 %v683_v24, %v947_v21 }
 0x10d   :  { %v212_v26 = vpop.f32.mrf.mxu0  ;;  %v611_v28 = vsel %vm252_vm0, 1.0, %v880_v27 }
 0x10e   :  { %v213_v29 = vadd.f32 %v947_v21, %v212_v26  ;;  %v255_v30 = vpack.c.bf16 %v611_v28, %v611_v28  ;;  %v259_v31 = vsel %vm252_vm0, %v612_v25, %v210_v23 }
 0x10f   :  { %v264_v32 = vmul.f32 0.9, %v259_v31  ;;  %v686_v43 = vpop.f32.mrf.mxu0 }
 0x110   :  { %257 = vst [vmem:[#allocation11] sm:$0xf] %v255_v30  ;;  %v234_v8 = vadd.f32 %v686_v43, %v947_v21 }
 0x111   :  { %v265_v33 = vadd.f32 %v264_v32, %v213_v29  ;;  %v225_v50 = vpop.f32.mrf.mxu0 }
 0x112   :  { %v226_v55 = vadd.f32 %v947_v21, %v225_v50 }
 0x113   :  { %vm266_vm1 = vcmp.gt.f32.partialorder %v265_v33, 1.0  ;;  %271 = vst [vmem:[#allocation13 + $0x8] sm:$0xff] %v265_v33  ;;  %v614_v34 = vadd.f32 -1.0, %v265_v33  ;;  %v687_v57 = vpop.f32.mrf.mxu0 }
 0x114   :  { %v613_v35 = vsel %vm266_vm1, 1.0, %v880_v27  ;;  %v237_v15 = vadd.f32 %v687_v57, %v947_v21 }
 0x115   :  { %v269_v36 = vpack.c.bf16 %v613_v35, %v613_v35  ;;  %v275_v37 = vsel %vm266_vm1, %v614_v34, %v265_v33  ;;  %v228_v59 = vpop.f32.mrf.mxu0 }
 0x116   :  { %v280_v39 = vmul.f32 0.9, %v275_v37  ;;  %v229_v0 = vadd.f32 %v947_v21, %v228_v59 }
 0x117   :  { %273 = vst [vmem:[#allocation11 + $0x4] sm:$0xf] %v269_v36 }
 0x118   :  { %v281_v40 = vadd.f32 %v280_v39, %v218_v38 }
 0x11a   :  { %287 = vst [vmem:[#allocation13 + $0x10] sm:$0xff] %v281_v40  ;;  %vm282_vm2 = vcmp.gt.f32.partialorder %v281_v40, 1.0  ;;  %v616_v41 = vadd.f32 -1.0, %v281_v40 }
 0x11b   :  { %v615_v42 = vsel %vm282_vm2, 1.0, %v880_v27 }
 0x11c   :  { %v285_v44 = vpack.c.bf16 %v615_v42, %v615_v42  ;;  %v291_v45 = vsel %vm282_vm2, %v616_v41, %v281_v40 }
 0x11d   :  { %v296_v47 = vmul.f32 0.9, %v291_v45 }
 0x11e   :  { %289 = vst [vmem:[#allocation11 + $0x8] sm:$0xf] %v285_v44  ;;  %v740_v48 = vld [vmem:[#allocation11] sm:$0xff]  }
 0x11f   :  { %v297_v49 = vadd.f32 %v296_v47, %v221_v46  ;;  %704 = vmatprep.mubr.bf16.mxu1 %v740_v48 }
 0x121   :  { %vm298_vm3 = vcmp.gt.f32.partialorder %v297_v49, 1.0  ;;  %303 = vst [vmem:[#allocation13 + $0x18] sm:$0xff] %v297_v49  ;;  %v618_v51 = vadd.f32 -1.0, %v297_v49 }
 0x122   :  { %v617_v52 = vsel %vm298_vm3, 1.0, %v880_v27 }
 0x123   :  { %v301_v53 = vpack.c.bf16 %v617_v52, %v617_v52  ;;  %v307_v54 = vsel %vm298_vm3, %v618_v51, %v297_v49 }
 0x124   :  { %v312_v56 = vmul.f32 0.9, %v307_v54 }
 0x125   :  { %305 = vst [vmem:[#allocation11 + $0xc] sm:$0xf] %v301_v53 }
 0x126   :  { %v313_v58 = vadd.f32 %v312_v56, %v226_v55 }
 0x128   :  { %319 = vst [vmem:[#allocation13 + $0x20] sm:$0xff] %v313_v58  ;;  %vm314_vm4 = vcmp.gt.f32.partialorder %v313_v58, 1.0  ;;  %v620_v60 = vadd.f32 -1.0, %v313_v58 }
 0x129   :  { %v619_v61 = vsel %vm314_vm4, 1.0, %v880_v27 }
 0x12a   :  { %v317_v62 = vpack.c.bf16 %v619_v61, %v619_v61  ;;  %v323_v63 = vsel %vm314_vm4, %v620_v60, %v313_v58 }
 0x12b   :  { %v328_v1 = vmul.f32 0.9, %v323_v63 }
 0x12c   :  { %321 = vst [vmem:[#allocation11 + $0x10] sm:$0xf] %v317_v62  ;;  %v744_v2 = vld [vmem:[#allocation11 + $0x8] sm:$0xff]  }
 0x12d   :  { %v329_v3 = vadd.f32 %v328_v1, %v229_v0  ;;  %705 = vmatmul.mubr.bf16.vlgmr.msra.gmra.mxu1 %v744_v2 }
 0x12f   :  { %vm330_vm5 = vcmp.gt.f32.partialorder %v329_v3, 1.0  ;;  %335 = vst [vmem:[#allocation13 + $0x28] sm:$0xff] %v329_v3  ;;  %v622_v4 = vadd.f32 -1.0, %v329_v3 }
 0x130   :  { %v621_v5 = vsel %vm330_vm5, 1.0, %v880_v27 }
 0x131   :  { %v333_v6 = vpack.c.bf16 %v621_v5, %v621_v5  ;;  %v339_v7 = vsel %vm330_vm5, %v622_v4, %v329_v3 }
 0x132   :  { %v344_v9 = vmul.f32 0.9, %v339_v7 }
 0x133   :  { %337 = vst [vmem:[#allocation11 + $0x14] sm:$0xf] %v333_v6 }
 0x134   :  { %v345_v10 = vadd.f32 %v344_v9, %v234_v8 }
 0x136   :  { %vm346_vm6 = vcmp.gt.f32.partialorder %v345_v10, 1.0  ;;  %351 = vst [vmem:[#allocation13 + $0x30] sm:$0xff] %v345_v10  ;;  %v624_v11 = vadd.f32 -1.0, %v345_v10 }
 0x137   :  { %v623_v12 = vsel %vm346_vm6, 1.0, %v880_v27 }
 0x138   :  { %v349_v13 = vpack.c.bf16 %v623_v12, %v623_v12  ;;  %v355_v14 = vsel %vm346_vm6, %v624_v11, %v345_v10 }
 0x139   :  { %v360_v16 = vmul.f32 0.9, %v355_v14 }
 0x13a   :  { %353 = vst [vmem:[#allocation11 + $0x18] sm:$0xf] %v349_v13  ;;  %v745_v17 = vld [vmem:[#allocation11 + $0x10] sm:$0xff]  }
 0x13b   :  { %v361_v18 = vadd.f32 %v360_v16, %v237_v15  ;;  %708 = vmatprep.mubr.bf16.mxu1 %v745_v17 }
 0x13d   :  { %vm362_vm7 = vcmp.gt.f32.partialorder %v361_v18, 1.0  ;;  %367 = vst [vmem:[#allocation13 + $0x38] sm:$0xff] %v361_v18 }
 0x13e   :  { %v625_v19 = vsel %vm362_vm7, 1.0, %v880_v27 }
 0x13f   :  { %v365_v20 = vpack.c.bf16 %v625_v19, %v625_v19 }
 0x141   :  { %369 = vst [vmem:[#allocation11 + $0x1c] sm:$0xf] %v365_v20 }
 0x148   :  { %v746_v22 = vld [vmem:[#allocation11 + $0x18] sm:$0xff]  }
 0x149   :  { %709 = vmatmul.mubr.bf16.gmra.mxu1 %v746_v22 }
 0x14a   :  { %818 = shalt.err (!%p815_p5)
}
 0x14b   :  { %572 = dma.vmem_to_hbm [thread:$0]  %s567_s17, 512, %s992_s6, [#allocation12], %s877_s29, %s877_s29, %s878_s30  }
 0x14c   :  { %s882_s21 = smov [#allocation13]  }
 0x14d   :  { %s578_s22 = sshll.u32 %s882_s21, 4  ;;  %s579_s22 = int_to_ptr.vmem [resolvable:$true] %s578_s22 }
 0x14e   :  { %s827_s23 = scalar_lea.vmem %s579_s22, 1024  ;;  %p832_p7 = scmp.lt.s32.totalorder %s579_s22, %s579_s22 }
 0x14f   :  { %p828_p6 = scmp.ne.s32.totalorder %s579_s22, %s827_s23  ;;  %p833_p8 = scmp.lt.s32.totalorder %s827_s23, %s827_s23 }
 0x151   :  { %p834_p9 = por %p833_p8, %p832_p7 }
 0x153   :  { %p835_p10 = pnand %p834_p9, %p828_p6 }
 0x155   :  { %838 = shalt.err (!%p835_p10)
}
 0x156   :  { %s883_s24 = smov 128   ;;  %s884_s25 = smov 8   ;;  %v627_v21 = vld [vmem:[%s990_s4] ss:$0 sm:$0xff] }
 0x157   :  { %584 = dma.vmem_to_hbm [thread:$0]  %s579_s22, 1024, %s993_s7, [#allocation12], %s883_s24, %s883_s24, %s884_s25  }
 0x158   :  { %s885_s7 = smov [#allocation10]  }
 0x159   :  { %s554_s4 = sshll.u32 %s885_s7, 4  ;;  %s555_s4 = int_to_ptr.vmem [resolvable:$true] %s554_s4 }
 0x15a   :  { %s847_s29 = scalar_lea.vmem %s555_s4, 1024  ;;  %p852_p12 = scmp.lt.s32.totalorder %s555_s4, %s555_s4 }
 0x15b   :  { %p848_p11 = scmp.ne.s32.totalorder %s555_s4, %s847_s29  ;;  %p853_p13 = scmp.lt.s32.totalorder %s847_s29, %s847_s29 }
 0x15d   :  { %p854_p0 = por %p853_p13, %p852_p12 }
 0x15f   :  { %p855_p1 = pnand %p854_p0, %p848_p11 }
 0x1ed   :  { %v706_v23 = vpop.f32.mrf.mxu1 }
 0x1ee   :  { %v519_v24 = vadd.f32 %v706_v23, %v627_v21 }
 0x1ef   :  { %v510_v25 = vpop.f32.mrf.mxu1 }
 0x1f0   :  { %543 = vst [vmem:[#allocation10 + $0x10] sm:$0xff] %v519_v24  ;;  %v511_v26 = vadd.f32 %v627_v21, %v510_v25 }
 0x1f1   :  { %v707_v27 = vpop.f32.mrf.mxu1 }
 0x1f2   :  { %541 = vst [vmem:[#allocation10] sm:$0xff] %v511_v26  ;;  %v522_v28 = vadd.f32 %v707_v27, %v627_v21 }
 0x1f3   :  { %v513_v29 = vpop.f32.mrf.mxu1 }
 0x1f4   :  { %544 = vst [vmem:[#allocation10 + $0x18] sm:$0xff] %v522_v28  ;;  %v514_v30 = vadd.f32 %v627_v21, %v513_v29 }
 0x1f6   :  { %542 = vst [vmem:[#allocation10 + $0x8] sm:$0xff] %v514_v30 }
 0x209   :  { %v710_v31 = vpop.f32.mrf.mxu1 }
 0x20a   :  { %v535_v32 = vadd.f32 %v710_v31, %v627_v21 }
 0x20b   :  { %v526_v33 = vpop.f32.mrf.mxu1 }
 0x20c   :  { %547 = vst [vmem:[#allocation10 + $0x30] sm:$0xff] %v535_v32  ;;  %v527_v34 = vadd.f32 %v627_v21, %v526_v33 }
 0x20d   :  { %v711_v35 = vpop.f32.mrf.mxu1 }
 0x20e   :  { %545 = vst [vmem:[#allocation10 + $0x20] sm:$0xff] %v527_v34  ;;  %v538_v36 = vadd.f32 %v711_v35, %v627_v21 }
 0x20f   :  { %v529_v37 = vpop.f32.mrf.mxu1 }
 0x210   :  { %548 = vst [vmem:[#allocation10 + $0x38] sm:$0xff] %v538_v36  ;;  %v530_v38 = vadd.f32 %v627_v21, %v529_v37 }
 0x212   :  { %546 = vst [vmem:[#allocation10 + $0x28] sm:$0xff] %v530_v38 }
 0x213   :  { %858 = shalt.err (!%p855_p1)
}
 0x214   :  { %560 = dma.vmem_to_hbm [thread:$0]  %s555_s4, 1024, %s991_s5, [#allocation6], %s883_s24, %s883_s24, %s884_s25  }
 0x215   :  { %871 = dma.done.wait [#allocation6], 1024  }
 0x216   :  { %872 = vsyncadd [#allocation6], 4294966272 }
 0x217   :  { %873 = dma.done.wait [#allocation12], 1536  }
 0x218   :  { %874 = vsyncadd [#allocation12], 4294965760 }
 0x219   :  { %594 = vsyncpa [#allocation5], 1 }
 0x21a   :  { %595 = vsyncpa [#allocation8], 1 }
 0x21b   :  { %596 = vsyncpa [#allocation6], 1 }
 0x21c   :  { %597 = vsyncpa [#allocation12], 1 }

</bundles_post_ra>
